<compile_context>
chip_gen: v6e
topology: v6e:2x2x1
jax: 0.10.0
libtpu: 0.0.40
codegen_flags: <defaults>
</compile_context>

<pallas_src>
import functools

import jax
import jax.numpy as jnp
from jax.experimental import pallas as pl
from jax.experimental.pallas import tpu as pltpu


# ---------------------------------------------------------------------------
# Kernels
# ---------------------------------------------------------------------------
def _context_agg_kernel_single(x_ref, p_ref, o_ref, *, C, hw_valid, hw_padded):
    """Whole-HW slab per grid step: (nb, C, HWp) in -> (nb, C, HWp) out."""
    xf = x_ref[...].astype(jnp.float32)                  # (nb, C, HWp)
    nb = xf.shape[0]
    P = p_ref[...].astype(jnp.float32)

    wak = P[0:2, 0:C]                                    # (2, C) stacked [wa; wk]
    bak = P[0:2, C:C + 1]                                # (2, 1) stacked [ba; bk]
    wmv_t = P[2:2 + C, 0:C]                              # (C, C) = (Wm @ Wv).T
    bmv = P[2 + C:3 + C, 0:C]                            # (1, C) = (Wm @ bv + bm).T

    # Fused a/k 1x1 convs as one batched matmul. Mosaic's dot lowering wants
    # matching batch dims, so the tiny (nb,2,C) weight broadcast is kept on
    # purpose (it is negligible vs the slab and feeds the otherwise-idle MXU).
    wak_b = jnp.broadcast_to(wak, (nb, 2, C))
    logits = jnp.einsum("nkc,ncl->nkl", wak_b, xf,
                        preferred_element_type=jnp.float32) + bak[None, :, :]
    a = jax.nn.sigmoid(logits[:, 0:1, :])                # (nb, 1, HWp)
    k_logit = logits[:, 1:2, :]                          # (nb, 1, HWp)

    if hw_padded != hw_valid:
        # Mask padded columns out of the softmax (x is zero there already, so
        # only the normalizing sum needs protection).
        col = jax.lax.broadcasted_iota(jnp.int32, (1, 1, hw_padded), 2)
        k_logit = jnp.where(col < hw_valid, k_logit, jnp.float32(-1e30))

    # Softmax over HW with deferred normalization: only the per-batch 1/sum
    # scalar is applied later (after the folded matmul).
    k_max = jnp.max(k_logit, axis=-1, keepdims=True)     # (nb, 1, 1)
    k_exp = jnp.exp(k_logit - k_max)                     # (nb, 1, HWp), 0 at pads
    inv_sum = 1.0 / jnp.sum(k_exp, axis=-1)              # (nb, 1)

    # xk = sum_l x_l * exp_l  -> VPU multiply + XLU lane reduction
    # (no M=1 matmul contracting over the lane axis).
    xk = jnp.sum(xf * k_exp, axis=-1)                    # (nb, C)

    # z = (Wm Wv) (xk / sum) + (Wm bv + bm), folded weights.
    z = jnp.dot(xk, wmv_t, preferred_element_type=jnp.float32) * inv_sum + bmv

    # out = x + z * a   ((nb,C,1) * (nb,1,HWp) broadcast)
    out = xf + z[:, :, None] * a
    o_ref[...] = out.astype(o_ref.dtype)


def _context_agg_kernel_chunked(x_ref, p_ref, o_ref, m_sc, s_sc, xk_sc, *,
                                C, hw_valid, hw_chunk, n_chunks):
    """HW-chunked two-phase fallback for feature maps too big for one slab.

    Grid axis 1 has 2*n_chunks steps:
      t <  n_chunks : online-softmax reduction (running max / sum / xk) into
                      VMEM scratch for chunk t.
      t >= n_chunks : re-reads chunk (t - n_chunks) of x and writes
                      out = x + z * sigmoid(a_logit) using the final scratch.
    """
    t = pl.program_id(1)
    P = p_ref[...].astype(jnp.float32)
    wa = P[0:1, 0:C]
    ba = P[0:1, C:C + 1]
    wk = P[1:2, 0:C]
    bk = P[1:2, C:C + 1]
    wmv_t = P[2:2 + C, 0:C]                              # (C, C)
    bmv = P[2 + C:3 + C, 0:C]                            # (1, C)

    xf = x_ref[...].astype(jnp.float32)                  # (1, C, hw_chunk)
    nb = xf.shape[0]

    @pl.when(t == 0)
    def _init():
        m_sc[...] = jnp.full_like(m_sc, -1e30)
        s_sc[...] = jnp.zeros_like(s_sc)
        xk_sc[...] = jnp.zeros_like(xk_sc)

    @pl.when(t < n_chunks)
    def _reduce():
        wk_b = jnp.broadcast_to(wk, (nb, 1, C))
        k_logit = jnp.einsum("nkc,ncl->nkl", wk_b, xf,
                             preferred_element_type=jnp.float32) + bk[None, :, :]
        if hw_chunk * n_chunks != hw_valid:
            col = (jax.lax.broadcasted_iota(jnp.int32, (1, 1, hw_chunk), 2)
                   + t * hw_chunk)
            k_logit = jnp.where(col < hw_valid, k_logit, jnp.float32(-1e30))
        cmax = jnp.max(k_logit, axis=-1)                 # (nb, 1)
        m_new = jnp.maximum(m_sc[...], cmax)             # (nb, 1)
        alpha = jnp.exp(m_sc[...] - m_new)               # (nb, 1)
        p = jnp.exp(k_logit - m_new[:, :, None])         # (nb, 1, chunk); 0 at pads
        s_sc[...] = alpha * s_sc[...] + jnp.sum(p, axis=-1)
        xk_sc[...] = alpha * xk_sc[...] + jnp.sum(xf * p, axis=-1)
        m_sc[...] = m_new

    @pl.when(t >= n_chunks)
    def _emit():
        inv_sum = 1.0 / s_sc[...]                        # (nb, 1)
        z = (jnp.dot(xk_sc[...], wmv_t, preferred_element_type=jnp.float32)
             * inv_sum + bmv)                            # (nb, C)
        wa_b = jnp.broadcast_to(wa, (nb, 1, C))
        a_logit = jnp.einsum("nkc,ncl->nkl", wa_b, xf,
                             preferred_element_type=jnp.float32) + ba[None, :, :]
        a = jax.nn.sigmoid(a_logit)                      # (nb, 1, chunk)
        out = xf + z[:, :, None] * a
        o_ref[...] = out.astype(o_ref.dtype)


# ---------------------------------------------------------------------------
# Wrapper
# ---------------------------------------------------------------------------
def _round_up(v, m):
    return (v + m - 1) // m * m


def _pad_hw(x3, target):
    pad = target - x3.shape[-1]
    if pad:
        x3 = jnp.pad(x3, ((0, 0), (0, 0), (0, pad)))
    return x3


def _pack_params(params, C):
    """Fold Wm@Wv / Wm@bv+bm and pack everything into one lane-dense block.

    Layout (rows x round_up(C+1, 128) cols):
      row 0        : [wa | ba]
      row 1        : [wk | bk]
      rows 2..C+1  : (Wm @ Wv).T
      row C+2      : (Wm @ bv + bm).T
    """
    wa, ba = params["wa"], params["ba"]
    wk, bk = params["wk"], params["bk"]
    wv, bv = params["wv"], params["bv"]
    wm, bm = params["wm"], params["bm"]
    wmv_t = (wm @ wv).T                                  # (C, C)
    bmv_r = (wm @ bv + bm).T                             # (1, C)
    PW = _round_up(C + 1, 128)

    def row(m):
        return jnp.pad(m, ((0, 0), (0, PW - m.shape[1])))

    packed = jnp.concatenate([
        row(jnp.concatenate([wa, ba], axis=1)),
        row(jnp.concatenate([wk, bk], axis=1)),
        row(wmv_t),
        row(bmv_r),
    ], axis=0).astype(jnp.float32)
    return packed                                        # (C + 3, PW)


def context_aggregation(x_nchw, params, *, hw_chunk=None):
    """x_nchw: (N, C, H, W) float. params: dict of 1x1-conv weights/biases.

    hw_chunk: optional explicit HW chunk (multiple of 128) to force the
    chunked fallback; None -> automatic (chunk only when a single batch
    element does not fit the VMEM budget).
    """
    N, C, H, W = x_nchw.shape
    HW = H * W
    dtype = x_nchw.dtype
    itemsize = dtype.itemsize

    packed = _pack_params(params, C)
    R, PW = packed.shape

    # Per-generation VMEM sizing: v5e/v6e have 128 MiB physical, v7x only 64.
    try:
        vmem_cap = int(pltpu.get_tpu_info().vmem_capacity_bytes)
    except Exception:
        vmem_cap = 64 * 1024 * 1024
    vmem_limit = min(vmem_cap * 3 // 4, 96 * 1024 * 1024)

    # Peak VMEM per batch element per grid step: 2x double-buffered in block,
    # 2x out block, plus f32 in-kernel intermediates (xf copy, k_exp, the f32
    # output before the cast, einsum temporaries) ~= 8x the raw slab bytes for
    # f32 inputs and ~10x for narrower dtypes (intermediates stay f32).
    mult = 8 if itemsize >= 4 else 10

    x3 = x_nchw.reshape(N, C, HW)
    hw_lane = _round_up(HW, 128)                         # lane-dense output width
    bytes_per_batch = C * hw_lane * itemsize
    nb_budget = vmem_limit // (mult * bytes_per_batch)

    if hw_chunk is None and nb_budget >= 1:
        # ------------------------ single-pass path ------------------------
        nb = max(1, min(N, int(nb_budget)))
        if N >= 2:                       # keep >=2 steps for dual-TC / megacore
            nb = min(nb, max(1, N // 2))
        while N % nb:
            nb -= 1
        hw_pad = hw_lane
        xp = _pad_hw(x3, hw_pad)
        grid = (N // nb,)

        kernel = functools.partial(_context_agg_kernel_single, C=C,
                                   hw_valid=HW, hw_padded=hw_pad)
        cost = pl.CostEstimate(
            flops=int(N * (6 * C * hw_pad + 4 * hw_pad + 2 * C * C)),
            transcendentals=int(3 * N * hw_pad),
            bytes_accessed=int(2 * N * C * hw_pad * itemsize + R * PW * 4))

        out = pl.pallas_call(
            kernel,
            out_shape=jax.ShapeDtypeStruct((N, C, hw_pad), dtype),
            grid_spec=pltpu.PrefetchScalarGridSpec(
                num_scalar_prefetch=0,
                grid=grid,
                in_specs=[
                    pl.BlockSpec((nb, C, hw_pad), lambda n: (n, 0, 0)),   # x slab
                    pl.BlockSpec((R, PW), lambda n: (0, 0)),              # params
                ],
                out_specs=pl.BlockSpec((nb, C, hw_pad), lambda n: (n, 0, 0)),
            ),
            compiler_params=pltpu.CompilerParams(
                dimension_semantics=("parallel",),
                vmem_limit_bytes=int(vmem_limit)),
            cost_estimate=cost,
        )(xp, packed)
    else:
        # ----------------------- HW-chunked fallback ----------------------
        if hw_chunk is None:
            max_chunk = max(128, (vmem_limit // (mult * C * itemsize)) // 128 * 128)
            max_chunk = min(max_chunk, hw_lane)
            n_est = -(-hw_lane // max_chunk)
            hw_chunk = _round_up(-(-hw_lane // n_est), 128)   # balanced chunks
        else:
            hw_chunk = min(max(128, _round_up(int(hw_chunk), 128)), hw_lane)
        n_chunks = -(-HW // hw_chunk)
        hw_pad = n_chunks * hw_chunk

        xp = _pad_hw(x3, hw_pad)
        grid = (N, 2 * n_chunks)

        kernel = functools.partial(_context_agg_kernel_chunked, C=C,
                                   hw_valid=HW, hw_chunk=hw_chunk,
                                   n_chunks=n_chunks)
        cost = pl.CostEstimate(
            flops=int(N * (8 * C * hw_pad + 4 * hw_pad + 2 * C * C)),
            transcendentals=int(3 * N * hw_pad),
            bytes_accessed=int(3 * N * C * hw_pad * itemsize + R * PW * 4))

        out = pl.pallas_call(
            kernel,
            out_shape=jax.ShapeDtypeStruct((N, C, hw_pad), dtype),
            grid_spec=pltpu.PrefetchScalarGridSpec(
                num_scalar_prefetch=0,
                grid=grid,
                in_specs=[
                    pl.BlockSpec((1, C, hw_chunk),
                                 lambda n, t: (n, 0, t % n_chunks)),
                    pl.BlockSpec((R, PW), lambda n, t: (0, 0)),
                ],
                out_specs=pl.BlockSpec(
                    (1, C, hw_chunk),
                    lambda n, t: (n, 0, jnp.maximum(t - n_chunks, 0))),
                scratch_shapes=[
                    pltpu.VMEM((1, 1), jnp.float32),     # running max
                    pltpu.VMEM((1, 1), jnp.float32),     # running sum
                    pltpu.VMEM((1, C), jnp.float32),     # running xk
                ],
            ),
            compiler_params=pltpu.CompilerParams(
                dimension_semantics=("parallel", "arbitrary"),
                vmem_limit_bytes=int(vmem_limit)),
            cost_estimate=cost,
        )(xp, packed)

    out = out[:, :, :HW]
    return out.reshape(N, C, H, W)


# ---------------------------------------------------------------------------
# Reference & test
# ---------------------------------------------------------------------------
def _reference_forward(x_nchw, params):
    """Plain-JAX reference replicating the PyTorch forward pass."""
    N, C, H, W = x_nchw.shape
    HW = H * W
    c = params["wv"].shape[0]
    xf = x_nchw.reshape(N, C, HW).astype(jnp.float32)

    a = jax.nn.sigmoid(jnp.einsum("oc,ncl->nol", params["wa"], xf)
                       + params["ba"].reshape(1, 1, 1))                  # (N,1,HW)
    k_logit = (jnp.einsum("oc,ncl->nol", params["wk"], xf)
               + params["bk"].reshape(1, 1, 1))
    k = jax.nn.softmax(k_logit, axis=-1)                                 # (N,1,HW)
    v = jnp.einsum("oc,ncl->nol", params["wv"], xf) + params["bv"].reshape(1, c, 1)
    y = jnp.sum(v * k, axis=-1)                                          # (N,c)
    z = jnp.einsum("oc,nc->no", params["wm"], y) + params["bm"].reshape(1, C)
    out = xf + z[:, :, None] * a                                         # (N,C,HW)
    return out.reshape(N, C, H, W)


def _init_params(key, in_channels, reduction=1):
    # The module's constant_init of conv_m would make the block an identity;
    # use small random weights so the math is actually exercised.
    c = max(in_channels // reduction, 1)
    ks = jax.random.split(key, 8)
    scale = 0.1
    return dict(
        wa=scale * jax.random.normal(ks[0], (1, in_channels), jnp.float32),
        ba=scale * jax.random.normal(ks[1], (1, 1), jnp.float32),
        wk=scale * jax.random.normal(ks[2], (1, in_channels), jnp.float32),
        bk=scale * jax.random.normal(ks[3], (1, 1), jnp.float32),
        wv=scale * jax.random.normal(ks[4], (c, in_channels), jnp.float32),
        bv=scale * jax.random.normal(ks[5], (c, 1), jnp.float32),
        wm=scale * jax.random.normal(ks[6], (in_channels, c), jnp.float32),
        bm=scale * jax.random.normal(ks[7], (in_channels, 1), jnp.float32),
    )


if __name__ == "__main__":
    base_key = jax.random.PRNGKey(0)

    def run_case(idx, name, N, C, H, W, reduction=1, hw_chunk=None):
        key = jax.random.fold_in(base_key, idx)
        kx, kp = jax.random.split(key)
        x = jax.random.normal(kx, (N, C, H, W), jnp.float32)
        params = _init_params(kp, C, reduction)
        out = jax.block_until_ready(
            context_aggregation(x, params, hw_chunk=hw_chunk))
        ref = _reference_forward(x, params)
        assert out.shape == x.shape, f"{name}: bad shape {out.shape}"
        assert jnp.allclose(out, ref, atol=2e-4, rtol=2e-4), f"{name}: mismatch"

    # 1) single-pass path, lane-aligned HW (16*16 = 256)
    run_case(0, "single_pass_aligned", N=2, C=4, H=16, W=16)
    # 2) single-pass path with HW padding + softmax mask (10*10 = 100 -> 128)
    run_case(1, "single_pass_padded", N=2, C=8, H=10, W=10)
    # 3) chunked two-phase fallback with padding (18*18 = 324, chunks of 128)
    run_case(2, "chunked_fallback", N=2, C=8, H=18, W=18, reduction=2,
             hw_chunk=128)

    print("KERNEL_OK")
</pallas_src>

<mosaic_0001>
module attributes {stable_mosaic.version = 11 : i64} {
  func.func @_context_agg_kernel_single(%arg0: i32, %arg1: memref<1x4x256xf32, #tpu.memory_space<vmem>>, %arg2: memref<7x128xf32, #tpu.memory_space<vmem>>, %arg3: memref<1x4x256xf32, #tpu.memory_space<vmem>>) attributes {dimension_semantics = [#tpu.dimension_semantics<parallel>], iteration_bounds = array<i64: 2>, scalar_prefetch = 0 : i64, scratch_operands = 0 : i64, tpu.core_type = #tpu.core_type<tc>, window_params = [{transform_indices = @transform_0, window_bounds = array<i64: 1, 4, 256>}, {pipeline_mode = #tpu.pipeline_mode<synchronous>, transform_indices = @transform_1, window_bounds = array<i64: 7, 128>}, {transform_indices = @transform_2, window_bounds = array<i64: 1, 4, 256>}]} {
    %c0 = arith.constant 0 : index
    %c0_0 = arith.constant 0 : index
    %c0_1 = arith.constant 0 : index
    %0 = vector.load %arg1[%c0, %c0_0, %c0_1] : memref<1x4x256xf32, #tpu.memory_space<vmem>>, vector<1x4x256xf32>
    %c0_2 = arith.constant 0 : index
    %c0_3 = arith.constant 0 : index
    %1 = vector.load %arg2[%c0_2, %c0_3] : memref<7x128xf32, #tpu.memory_space<vmem>>, vector<7x128xf32>
    %2 = vector.extract_strided_slice %1 {offsets = [0, 0], sizes = [2, 4], strides = [1, 1]} : vector<7x128xf32> to vector<2x4xf32>
    %3 = vector.extract_strided_slice %1 {offsets = [0, 4], sizes = [2, 1], strides = [1, 1]} : vector<7x128xf32> to vector<2x1xf32>
    %4 = vector.extract_strided_slice %1 {offsets = [2, 0], sizes = [4, 4], strides = [1, 1]} : vector<7x128xf32> to vector<4x4xf32>
    %5 = vector.extract_strided_slice %1 {offsets = [6, 0], sizes = [1, 4], strides = [1, 1]} : vector<7x128xf32> to vector<1x4xf32>
    %6 = vector.shape_cast %2 : vector<2x4xf32> to vector<1x2x4xf32>
    "tpu.trace_start"() <{level = 10 : i32, message = "nkc,ncl->nkl"}> : () -> ()
    %cst = arith.constant dense<0.000000e+00> : vector<1x2x256xf32>
    %7 = tpu.matmul %6, %0, %cst {dimension_numbers = #tpu.dot_dimension_numbers<[2], [1], [1], [2], [0, 0, 0, 1, 1, 2], [0], [0]>} : vector<1x2x4xf32>, vector<1x4x256xf32>, vector<1x2x256xf32> -> vector<1x2x256xf32>
    "tpu.trace_stop"() : () -> ()
    %8 = vector.shape_cast %3 : vector<2x1xf32> to vector<1x2x1xf32>
    %9 = vector.broadcast %8 : vector<1x2x1xf32> to vector<1x2x256xf32>
    %10 = arith.addf %7, %9 : vector<1x2x256xf32>
    %11 = vector.extract_strided_slice %10 {offsets = [0, 0, 0], sizes = [1, 1, 256], strides = [1, 1, 1]} : vector<1x2x256xf32> to vector<1x1x256xf32>
    %12 = arith.negf %11 : vector<1x1x256xf32>
    %13 = math.exp %12 : vector<1x1x256xf32>
    %cst_4 = arith.constant 1.000000e+00 : f32
    %14 = vector.broadcast %cst_4 : f32 to vector<1x1x256xf32>
    %15 = arith.addf %14, %13 : vector<1x1x256xf32>
    %16 = arith.divf %14, %15 : vector<1x1x256xf32>
    %17 = vector.extract_strided_slice %10 {offsets = [0, 1, 0], sizes = [1, 1, 256], strides = [1, 1, 1]} : vector<1x2x256xf32> to vector<1x1x256xf32>
    %cst_5 = arith.constant dense<0xFF800000> : vector<1x1xf32>
    %18 = vector.multi_reduction <maximumf>, %17, %cst_5 [2] : vector<1x1x256xf32> to vector<1x1xf32>
    %19 = vector.shape_cast %18 : vector<1x1xf32> to vector<1x1x1xf32>
    %20 = vector.broadcast %19 : vector<1x1x1xf32> to vector<1x1x256xf32>
    %21 = arith.subf %17, %20 : vector<1x1x256xf32>
    %22 = math.exp %21 : vector<1x1x256xf32>
    %cst_6 = arith.constant dense<0.000000e+00> : vector<1x1xf32>
    %23 = vector.multi_reduction <add>, %22, %cst_6 [2] : vector<1x1x256xf32> to vector<1x1xf32>
    %cst_7 = arith.constant 1.000000e+00 : f32
    %24 = vector.broadcast %cst_7 : f32 to vector<1x1xf32>
    %25 = arith.divf %24, %23 : vector<1x1xf32>
    %26 = vector.broadcast %22 : vector<1x1x256xf32> to vector<1x4x256xf32>
    %27 = arith.mulf %0, %26 : vector<1x4x256xf32>
    %cst_8 = arith.constant dense<0.000000e+00> : vector<1x4xf32>
    %28 = vector.multi_reduction <add>, %27, %cst_8 [2] : vector<1x4x256xf32> to vector<1x4xf32>
    %cst_9 = arith.constant dense<0.000000e+00> : vector<1x4xf32>
    %29 = tpu.matmul %28, %4, %cst_9 {dimension_numbers = #tpu.dot_dimension_numbers<[1], [0], [0], [1], [0, 0, 1, 1], [], []>} : vector<1x4xf32>, vector<4x4xf32>, vector<1x4xf32> -> vector<1x4xf32>
    %30 = vector.broadcast %25 : vector<1x1xf32> to vector<1x4xf32>
    %31 = arith.mulf %29, %30 : vector<1x4xf32>
    %32 = arith.addf %31, %5 : vector<1x4xf32>
    %33 = vector.shape_cast %32 : vector<1x4xf32> to vector<1x4x1xf32>
    %34 = vector.broadcast %33 : vector<1x4x1xf32> to vector<1x4x256xf32>
    %35 = vector.broadcast %16 : vector<1x1x256xf32> to vector<1x4x256xf32>
    %36 = arith.mulf %34, %35 : vector<1x4x256xf32>
    %37 = arith.addf %0, %36 : vector<1x4x256xf32>
    %c0_10 = arith.constant 0 : index
    %c0_11 = arith.constant 0 : index
    %c0_12 = arith.constant 0 : index
    %38 = vector.load %arg3[%c0_10, %c0_11, %c0_12] : memref<1x4x256xf32, #tpu.memory_space<vmem>>, vector<1x4x256xf32>
    tpu.vector_store %arg3[%c0_10, %c0_11, %c0_12], %37 {strides = array<i32>} : memref<1x4x256xf32, #tpu.memory_space<vmem>>, vector<1x4x256xf32>,
    return
  }
  func.func @transform_0(%arg0: i32) -> (i32, i32, i32) {
    %c0_i32 = arith.constant 0 : i32
    %c0_i32_0 = arith.constant 0 : i32
    %c0_i32_1 = arith.constant 0 : i32
    return %arg0, %c0_i32, %c0_i32_0 : i32, i32, i32
  }
  func.func @transform_1(%arg0: i32) -> (i32, i32) {
    %c0_i32 = arith.constant 0 : i32
    %c0_i32_0 = arith.constant 0 : i32
    %c0_i32_1 = arith.constant 0 : i32
    return %c0_i32, %c0_i32_0 : i32, i32
  }
  func.func @transform_2(%arg0: i32) -> (i32, i32, i32) {
    %c0_i32 = arith.constant 0 : i32
    %c0_i32_0 = arith.constant 0 : i32
    %c0_i32_1 = arith.constant 0 : i32
    return %arg0, %c0_i32, %c0_i32_0 : i32, i32, i32
  }
}

</mosaic_0001>

<bundles_post_ra>
// kernel: tpu_custom_call.1
= control target key start
LH: loop header
LB: loop body
LE: loop exit
PB: predicated region body
PF: predicated region fallthrough
CT: control target
= control target key end

     0   :  { %7 = vsyncpa [#allocation3], 0  ;;  %s961_s0 = inlined_call_operand.hbm [shape: f32[2,4,256], index: 0, kind: input, shape index: {}]   ;;  %s962_s1 = inlined_call_operand.hbm [shape: f32[7,128], index: 1, kind: input, shape index: {}]   ;;  %s963_s2 = inlined_call_operand.hbm [shape: f32[2,4,256], index: 2, kind: output, shape index: {}]  }
   0x1   :  { %9 = vsyncpa [#allocation3 + $0x1], 0 }
   0x2   :  { %10 = vsyncpa [#allocation6], 0 }
   0x3   :  { %11 = vsyncpa [#allocation4], 0 }
   0x4   :  { %13 = vsyncpa [#allocation4 + $0x1], 0  ;;  %s773_s9 = smov 0   ;;  %s775_s10 = smov 0  }
   0x5   :  { %s777_s11 = smov 0   ;;  %s779_s12 = smov 0  }
   0x6 LB: > { %s794_s13 = sadd.s32 4294967295, %s750_s12   ;;  %s520_s14 = sadd.s32 4294967294, %s750_s12   ;;  %s750_s12 = sphi %s779_s12, %s986_s12   ;;  %s746_s11 = sphi %s777_s11, %s985_s11   ;;  %s742_s10 = sphi %s775_s10, %s984_s10   ;;  %s738_s9 = sphi %s773_s9, %s983_s9  }
   0x7   : > { %p39_p0 = scmp.ne.s32.totalorder %s742_s10, %s738_s9  ;;  %p964_p1 = scmp.eq.s32.totalorder %s794_s13, 0 }
   0x8   : > { %p90_p3 = scmp.eq.s32.totalorder %s520_s14, 1  ;;  %p521_p5 = scmp.ge.s32.totalorder %s750_s12, 1 }
   0x9   : > { %p803_p4 = por %p964_p1, %p39_p0  ;;  %p97_p7 = scmp.lt.s32.totalorder %s750_s12, 3 }
   0xa   : > { %p808_p6 = por %p90_p3, %p39_p0  ;;  %s752_s18 = smov [#allocation5]  }
   0xb   : > { %s968_s15 = scalar_select %p803_p4, 1, 0 }
   0xc   : > { %s969_s16 = scalar_select %p808_p6, 1, 0 }
   0xd   : > { %p813_p8 = pnand %p521_p5, %p97_p7  ;;  %s110_s19 = sshll.u32 %s752_s18, 4  ;;  %s111_s19 = int_to_ptr.vmem [resolvable:$true] %s110_s19 }
   0xe   : > { %s821_s20 = sadd.s32 1, %s750_s12   ;;  %s26_s24 = sadd.s32 1, %s746_s11 }
   0xf   : > { %s970_s17 = scalar_select %p813_p8, 1, 0 }
  0x10   : > { %p560_p10 = pneg %p813_p8  ;;  %s23_s22 = ssub.s32 %s750_s12, %s821_s20 }
  0x11   : > { %p831_p12 = scmp.eq.s32.totalorder %s23_s22, 0  ;;  %p33_p13 = scmp.ne.s32.totalorder %s746_s11, %s742_s10 }
  0x12   : > { %p825_p11 = pnand %p560_p10, %p964_p1  ;;  %s639_s25 = scalar_lea.vmem %s111_s19, 128 }
  0x13   : > { %p640_p3 = scmp.ne.s32.totalorder %s111_s19, %s639_s25  ;;  %p647_p9 = scmp.lt.s32.totalorder %s111_s19, %s111_s19 }
  0x14   : > { %p630_p0 = pneg %p825_p11  ;;  %p648_p2 = scmp.lt.s32.totalorder %s639_s25, %s639_s25 }
  0x16   : > { %p642_p5 = pnand %p640_p3, %p630_p0  ;;  %p649_p10 = por %p648_p2, %p647_p9 }
  0x18   : > { %p643_p7 = pneg %p642_p5 }
  0x1a   : > { %p650_p1 = pnand %p649_p10, %p643_p7 }
  0x1c   : > { %653 = shalt.err (!%p650_p1)
}
  0x1d   : > { %563 = dma.hbm_to_vmem [thread:$0]  (!%p825_p11), %s962_s1, 128, %s111_s19, [#allocation6]  }
  0x1e   : > { %s848_s28 = scalar_select %p831_p12, %s746_s11, %s26_s24  }
  0x1f   : > { %p34_p1 = scmp.eq.s32.totalorder %s750_s12, 0  ;;  %p973_p2 = scmp.eq.s32.totalorder %s794_s13, 1 }
  0x20   : > { %p573_p0 = scmp.lt.s32.totalorder %s750_s12, 2  ;;  %s121_s30 = sand.u32 1, %s746_s11  }
  0x21   : > { %p856_p9 = por %p973_p2, %p33_p13  ;;  %p35_p3 = por %p34_p1, %p33_p13 }
  0x22   : > { %s524_s3 = sshll.u32 %s121_s30, 3  ;;  %s543_s4 = sshll.u32 %s750_s12, 7 }
  0x23   : > { %s974_s29 = scalar_select %p856_p9, 1, 0 }
  0x24   : > { %s869_s7 = scalar_lea.hbm %s961_s0, %s543_s4  ;;  %s125_s8 = scalar_lea.vmem [#allocation2], %s524_s3 }
  0x25   : > { %s133_s14 = sshll.u32 %s125_s8, 4  ;;  %p871_p11 = pnand %p573_p0, %p35_p3  ;;  %s134_s14 = int_to_ptr.vmem [resolvable:$true] %s133_s14 }
  0x26   : > { %s122_s19 = scalar_lea.sflag [#allocation3], %s121_s30  ;;  %s654_s21 = scalar_lea.hbm %s869_s7, 128 }
  0x27   : > { %p655_p12 = scmp.ne.s32.totalorder %s869_s7, %s654_s21  ;;  %p656_p13 = pneg %p871_p11 }
  0x28   : > { %s659_s24 = scalar_lea.hbm %s961_s0, 256  ;;  %p660_p10 = scmp.lt.s32.totalorder %s869_s7, %s961_s0 }
  0x29   : > { %p657_p5 = pnand %p656_p13, %p655_p12  ;;  %p661_p1 = scmp.lt.s32.totalorder %s659_s24, %s654_s21 }
  0x2b   : > { %p658_p7 = pneg %p657_p5  ;;  %p662_p2 = por %p661_p1, %p660_p10 }
  0x2d   : > { %p663_p0 = pnand %p662_p2, %p658_p7 }
  0x2f   : > { %666 = shalt.err (!%p663_p0)
}
  0x30   : > { %s667_s27 = scalar_lea.vmem %s134_s14, 128  ;;  %s753_s30 = smov [#allocation2]  }
  0x31   : > { %p668_p3 = scmp.ne.s32.totalorder %s134_s14, %s667_s27  ;;  %s672_s3 = sshll.u32 %s753_s30, 4  ;;  %s673_s3 = int_to_ptr.vmem [resolvable:$false] %s672_s3 }
  0x32   : > { %s674_s4 = scalar_lea.vmem %s673_s3, 256  ;;  %p675_p12 = scmp.lt.s32.totalorder %s134_s14, %s673_s3 }
  0x33   : > { %p670_p6 = pnand %p668_p3, %p656_p13  ;;  %p676_p5 = scmp.lt.s32.totalorder %s674_s4, %s667_s27 }
  0x35   : > { %p671_p9 = pneg %p670_p6  ;;  %p677_p4 = por %p676_p5, %p675_p12 }
  0x37   : > { %p678_p8 = pnand %p677_p4, %p671_p9 }
  0x39   : > { %681 = shalt.err (!%p678_p8)
}
  0x3a   : > { %567 = dma.hbm_to_vmem [thread:$0]  (!%p871_p11), %s869_s7, 128, %s134_s14, %s122_s19  }
  0x3b   : > { %p976_p7 = scmp.ne.s32.totalorder %s970_s17, 0 }
  0x3c   : > { %s892_s5 = sand.u32 (!%p976_p7), 1, %s742_s10   ;;  %p977_p4 = scmp.ne.s32.totalorder (!%p976_p7), %s968_s15, 0 }
  0x3d   : > { %142 = sbr.rel (%p976_p7) target bundleno = 916 (0x394), region = 28  ;;  %s528_s6 = sshll.u32 (!%p976_p7), %s892_s5, 3 }
  0x3e   : > { %s145_s8 = scalar_lea.sflag (!%p976_p7), [#allocation3], %s892_s5  ;;  %s148_s21 = scalar_lea.vmem (!%p976_p7), [#allocation2], %s528_s6 }
  0x42   : > { %725 = dma.done.wait (%p977_p4), %s145_s8, 128  }
  0x43   : > { %727 = vsyncadd (%p977_p4), %s145_s8, 4294967168  ;;  %p978_p6 = scmp.eq.s32.totalorder %s794_s13, 0 }
  0x45   : > { %729 = dma.done.wait (%p978_p6), [#allocation6], 128   ;;  %p979_p8 = pmov %p978_p6 }
  0x46   : > { %v754_v0 = vmov 0.0   ;;  %v755_v1 = vmov 4   ;;  %v906_v2 = vld [vmem:[%s148_s21] sm:$0xff]  ;;  %vm185_vm0 = vcmask 1043456   ;;  %v174_v3 = vld [vmem:[#allocation5] sm:$0x7f]  ;;  %v292_v18 = vlaneseq }
  0x47   : > { %731 = vsyncadd (%p979_p8), [#allocation6], 4294967168  ;;  %254 = vmatprep.mubr.f32.mxu0 %v754_v0  ;;  %612 = vset.pattern.permute.xlu0 %v755_v1  ;;  %v181_v4 = vcombine.high %v906_v2, %v906_v2  ;;  %vm182_vm1 = vcmask 31744   ;;  %vm273_vm2 = vcmask 1041409   ;;  %v320_v34 = vrot.slane %v174_v3, 2  ;;  %s544_s15 = sshll.u32 %s794_s13, 7 }
  0x48   : > { %547 = vmatprep.subr.mxu1 %v754_v0  ;;  %177 = vperm.xlu0 %612, %v174_v3   ;;  %v293_v19 = vshrl.u32 %v292_v18, 7  ;;  %vm756_vm3 = vmmov 0   ;;  %v315_v35 = vand.u32 127, %v292_v18  ;;  %v399_v42 = vrot.slane %v174_v3, 6  ;;  %s172_s17 = scalar_lea.vmem [#allocation7], %s528_s6  ;;  %s438_s19 = scalar_lea.hbm %s963_s2, %s544_s15 }
  0x49   : > { %531 = vmatprep.subr.msk.mxu0 %vm185_vm0, %v181_v4  ;;  %548 = vmatpush3.msk.msra.mxu1 %vm185_vm0, %v320_v34  ;;  %s440_s7 = sshll.u32 %s172_s17, 4  ;;  %s426_s22 = scalar_lea.sflag [#allocation4], %s892_s5  ;;  %s441_s7 = int_to_ptr.vmem [resolvable:$true] %s440_s7 }
  0x4a   : > { %532 = vmatpush1.msk.msra.mxu0 %vm185_vm0, %v906_v2  ;;  %v294_v20 = vsub.s32 1, %v293_v19  ;;  %549 = vmatprep.mubr.msk.f32.mxu1 %vm756_vm3, %v754_v0  ;;  %v318_v36 = vsub.s32 %v315_v35, %v293_v19  ;;  %v404_v47 = vsub.s32 0, %v293_v19  ;;  %s682_s23 = scalar_lea.vmem %s441_s7, 128  ;;  %p980_p11 = scmp.ne.s32.totalorder %s974_s29, 0 }
  0x4b   : > { %533 = vmatmul.mubr.msk.f32.vlgmr.msra.gmra.mxu0 %vm182_vm1, %v174_v3  ;;  %p683_p9 = scmp.ne.s32.totalorder %s441_s7, %s682_s23  ;;  %s757_s24 = smov [#allocation7]  }
  0x4c   : > { %s686_s13 = sshll.u32 %s757_s24, 4  ;;  %s687_s13 = int_to_ptr.vmem [resolvable:$false] %s686_s13 }
  0x4d   : > { %p684_p13 = pnand %p683_p9, %p980_p11  ;;  %s688_s25 = scalar_lea.vmem %s687_s13, 256 }
  0x4e   : > { %p689_p1 = scmp.lt.s32.totalorder %s441_s7, %s687_s13  ;;  %p690_p2 = scmp.lt.s32.totalorder %s688_s25, %s682_s23 }
  0x4f   : > { %p685_p10 = pneg %p684_p13 }
  0x50   : > { %p691_p0 = por %p690_p2, %p689_p1 }
  0x52   : > { %p692_p3 = pnand %p691_p0, %p685_p10 }
  0xc3   : > { %v178_v5 = vpop.permute.xlu0 %177 }
 0x10b   : > { %v256_v6 = vpop.f32.mrf.mxu0 }
 0x10c   : > { %v257_v7 = vadd.f32 %v256_v6, %v178_v5 }
 0x10d   : > { %v258_v8 = vpop.f32.mrf.mxu0 }
 0x10e   : > { %v259_v9 = vadd.f32 %v258_v8, %v178_v5  ;;  %v274_v10 = vsel %vm273_vm2, %v257_v7, -inf  ;;  %v534_v49 = vmul.f32 -1.442695, %v257_v7 }
 0x110   : > { %v275_v11 = vsel %vm273_vm2, %v259_v9, -inf  ;;  %v535_v50 = vmul.f32 -1.442695, %v259_v9 }
 0x111   : > { %v276_v12 = vmax.f32 %v274_v10, %v275_v11 }
 0x113   : > { %277 = vmax.xlane.f32.xlu0 %v276_v12 }
 0x19c   : > { %v278_v13 = vpop.xlane.xlu0 %277 }
 0x19d   : > { %v279_v14 = vsub.f32 %v257_v7, %v278_v13  ;;  %v280_v15 = vsub.f32 %v259_v9, %v278_v13 }
 0x19f   : > { %v281_v16 = vmul.f32 1.442695, %v279_v14  ;;  %v283_v17 = vmul.f32 1.442695, %v280_v15 }
 0x1a1   : > { %614 = vpow2.f32 %v281_v16 }
 0x1a2   : > { %616 = vpow2.f32 %v283_v17 }
 0x1ae   : > { %v615_v21 = vpop.eup %614 }
 0x1af   : > { %v617_v22 = vpop.eup %616  ;;  %v295_v23 = vrot.slane %v615_v21, %v294_v20  ;;  %v285_v31 = vsel %vm273_vm2, %v615_v21, 0.0 }
 0x1b0   : > { %v299_v24 = vrot.slane %v617_v22, %v294_v20  ;;  %v286_v32 = vsel %vm273_vm2, %v617_v22, 0.0 }
 0x1b1   : > { %v287_v33 = vadd.f32 %v286_v32, %v285_v31 }
 0x1b2   : > { %v302_v25 = vcombine.low %v295_v23, %v299_v24 }
 0x1b4   : > { %v304_v26 = vmul.f32 %v302_v25, %v906_v2 }
 0x1b6   : > { %v306_v27 = vcombine.high %v304_v26, %v304_v26  ;;  %v308_v28 = vsel %vm185_vm0, %v304_v26, 0.0 }
 0x1b8   : > { %v309_v29 = vsel %vm185_vm0, %v306_v27, 0.0 }
 0x1b9   : > { %v310_v30 = vadd.f32 %v309_v29, %v308_v28 }
 0x1bb   : > { %311 = vadd.xlane.f32.xlu1 %v310_v30 }
 0x1bf   : > { %288 = vadd.xlane.f32.xlu1 %v287_v33 }
 0x244   : > { %v312_v37 = vpop.xlane.xlu1 %311 }
 0x245   : > { %v319_v38 = vrot.slane %v312_v37, %v318_v36 }
 0x247   : > { %550 = vmatmul.mubr.msk.f32.vlgmr.msra.gmra.mxu1 %vm182_vm1, %v319_v38 }
 0x248   : > { %v289_v39 = vpop.xlane.xlu1 %288 }
 0x249   : > { %618 = vrcp.f32 %v289_v39 }
 0x24a   : > { %620 = vpow2.f32 %v534_v49 }
 0x24b   : > { %622 = vpow2.f32 %v535_v50 }
 0x256   : > { %v619_v40 = vpop.eup %618 }
 0x257   : > { %v396_v41 = vrot.slane %v619_v40, 1  ;;  %v621_v51 = vpop.eup %620 }
 0x258   : > { %v623_v52 = vpop.eup %622  ;;  %v267_v53 = vadd.f32 1.0, %v621_v51 }
 0x259   : > { %v268_v54 = vadd.f32 1.0, %v623_v52 }
 0x25a   : > { %624 = vrcp.f32 %v267_v53 }
 0x25b   : > { %626 = vrcp.f32 %v268_v54 }
 0x267   : > { %v625_v55 = vpop.eup %624 }
 0x268   : > { %v627_v56 = vpop.eup %626  ;;  %v412_v58 = vrot.slane %v625_v55, %v404_v47 }
 0x269   : > { %v416_v57 = vrot.slane %v627_v56, %v404_v47 }
 0x307   : > { %v391_v43 = vpop.f32.mrf.mxu1 }
 0x308   : > { %v398_v44 = vmul.f32 %v396_v41, %v391_v43 }
 0x309   : > { %v551_v45 = vpop.f32.mrf.mxu1 }
 0x30a   : > { %v401_v46 = vadd.f32 %v399_v42, %v398_v44 }
 0x30c   : > { %v405_v48 = vrot.slane %v401_v46, %v404_v47 }
 0x30e   : > { %407 = vbcast.lane.b32.xlu1 %v405_v48, 256 }
 0x380   : > { %v408_v59 = vpop.permute.xlu1 %407 }
 0x381   : > { %v417_v60 = vmul.f32 %v412_v58, %v408_v59  ;;  %v418_v61 = vmul.f32 %v416_v57, %v408_v59 }
 0x383   : > { %v421_v62 = vcombine.low %v417_v60, %v418_v61 }
 0x385   : > { %v423_v63 = vadd.f32 %v421_v62, %v906_v2 }
 0x387   : > { %424 = vst [vmem:[%s172_s17] sm:$0xff] %v423_v63 }
 0x388   : > { %695 = shalt.err (!%p692_p3)
}
 0x389   : > { %s696_s26 = scalar_lea.hbm %s438_s19, 128  ;;  %s700_s3 = scalar_lea.hbm %s963_s2, 256 }
 0x38a   : > { %p697_p12 = scmp.ne.s32.totalorder %s438_s19, %s696_s26  ;;  %p701_p4 = scmp.lt.s32.totalorder %s438_s19, %s963_s2 }
 0x38b   : > { %p702_p6 = scmp.lt.s32.totalorder %s700_s3, %s696_s26 }
 0x38c   : > { %p698_p5 = pnand %p697_p12, %p980_p11 }
 0x38d   : > { %p703_p8 = por %p702_p6, %p701_p4 }
 0x38e   : > { %p699_p7 = pneg %p698_p5 }
 0x390   : > { %p704_p9 = pnand %p703_p8, %p699_p7 }
 0x392   : > { %707 = shalt.err (!%p704_p9)
}
 0x393   : > { %558 = dma.vmem_to_hbm [thread:$0]  (%p980_p11), %s441_s7, 128, %s438_s19, %s426_s22  }
 0x394 PF: > { %s452_s6 = sand.u32 1, %s738_s9   ;;  %p981_p13 = scmp.ne.s32.totalorder %s969_s16, 0 }
 0x395   : > { %p982_p10 = scmp.ge.s32.totalorder %s750_s12, 2  ;;  %s453_s8 = scalar_lea.sflag [#allocation4], %s452_s6 }
 0x397   : > { %p569_p1 = pnand %p982_p10, %p981_p13 }
 0x399   : > { %p570_p2 = pneg %p569_p1 }
 0x39b   : > { %733 = dma.done.wait (%p570_p2), %s453_s8, 128  }
 0x39c   : > { %735 = vsyncadd (%p570_p2), %s453_s8, 4294967168  ;;  %p16_p0 = scmp.ge.s32.totalorder %s821_s20, 4   ;;  %s983_s9 = smov %s742_s10 }
 0x39d   : > { %s984_s10 = smov %s746_s11  ;;  %s985_s11 = smov %s848_s28 }
 0x39e   : > { %s986_s12 = smov %s821_s20  ;;  %18 = sbr.rel (!%p16_p0) target bundleno = 6 (0x6), region = 77 }
 0x3a3   :  { %458 = vsyncpa [#allocation3], 1 }
 0x3a4   :  { %460 = vsyncpa [#allocation3 + $0x1], 1 }
 0x3a5   :  { %461 = vsyncpa [#allocation6], 1 }
 0x3a6   :  { %462 = vsyncpa [#allocation4], 1 }
 0x3a7   :  { %464 = vsyncpa [#allocation4 + $0x1], 1 }

</bundles_post_ra>
